<compile_context>
chip_gen: v7x
topology: tpu7x:2x2x1
jax: 0.10.0
libtpu: 0.0.40
codegen_flags: <defaults>
</compile_context>

<pallas_src>
import functools

import jax
import jax.numpy as jnp
from jax.experimental import pallas as pl
from jax.experimental.pallas import tpu as pltpu

_INV_SQRT2 = 0.7071067811865476
_VMEM_LIMIT = 48 * 1024 * 1024          # < 64 MiB physical VMEM on v7x, fine on v5e/v6e


# --------------------------------------------------------------------------- helpers
def _choose_tm(m, tm_max=256):
    """Largest 8-aligned row tile up to tm_max.  No megacore-driven shrinking:
    grid >= 2 only matters on v7x, and sub-MXU row tiles + extra grid steps hurt
    single-TensorCore v5e/v6e more than a second core helps at these sizes."""
    return min(tm_max, max(8, -(-m // 8) * 8))


def _pad_rows(a, m_pad):
    m = a.shape[0]
    return a if m == m_pad else jnp.pad(a, ((0, m_pad - m), (0, 0)))


def _row_spec(tm, d):
    return pl.BlockSpec((tm, d), lambda i: (i, 0))


def _const_spec(shape):
    # Grid-invariant block (weights / LN params): same block index every step, so the
    # pipeline never re-fetches it.
    # TODO(synk): on v7x at ViT-Base sizes, single-buffer these (pipeline_mode=pl.Buffered(1)).
    nd = len(shape)
    return pl.BlockSpec(shape, lambda i: (0,) * nd)


def _compiler_params(n_par):
    return pltpu.CompilerParams(
        dimension_semantics=("parallel",) * n_par,
        vmem_limit_bytes=_VMEM_LIMIT)


def _layernorm(x, g, b, eps):
    mean = jnp.mean(x, axis=-1, keepdims=True)
    xc = x - mean
    var = jnp.mean(xc * xc, axis=-1, keepdims=True)
    return xc * jax.lax.rsqrt(var + eps) * g + b


# --------------------------------------------------------------------------- kernels
def _attn_layer_kernel(x_ref, g_ref, b_ref, wqkv_ref, wout_ref, o_ref, *,
                       num_heads, d_model, scale, eps):
    """One full attention sub-layer for one batch element's token block."""
    x = x_ref[...].astype(jnp.float32)                                # (N, E) residual
    xn = _layernorm(x, g_ref[...].astype(jnp.float32),
                    b_ref[...].astype(jnp.float32), eps)
    qkv = jnp.dot(xn.astype(jnp.bfloat16), wqkv_ref[...],
                  preferred_element_type=jnp.float32).astype(jnp.bfloat16)  # (N, 3H)
    h_dim = num_heads * d_model
    acc = x                                                           # fused residual
    for h in range(num_heads):                                        # unrolled at trace time
        lo = h * d_model
        q = qkv[:, lo:lo + d_model]
        k = qkv[:, h_dim + lo:h_dim + lo + d_model]
        v = qkv[:, 2 * h_dim + lo:2 * h_dim + lo + d_model]
        s = jax.lax.dot_general(q, k, (((1,), (1,)), ((), ())),
                                preferred_element_type=jnp.float32) * scale
        s = s - jnp.max(s, axis=-1, keepdims=True)
        p = jnp.exp(s)
        p = p * pl.reciprocal(jnp.sum(p, axis=-1, keepdims=True), approx=True)
        o_h = jnp.dot(p.astype(jnp.bfloat16), v, preferred_element_type=jnp.float32)
        # per-head slice of W_out, accumulated straight into the f32 residual stream
        acc = acc + jnp.dot(o_h.astype(jnp.bfloat16),
                            wout_ref[lo:lo + d_model, :],
                            preferred_element_type=jnp.float32)
    o_ref[...] = acc.astype(o_ref.dtype)


def _ffn_kernel(x_ref, g_ref, b_ref, w1_ref, b1_ref, w2_ref, b2_ref, o_ref, *, eps):
    x = x_ref[...].astype(jnp.float32)
    xn = _layernorm(x, g_ref[...].astype(jnp.float32),
                    b_ref[...].astype(jnp.float32), eps)
    h = jnp.dot(xn.astype(jnp.bfloat16), w1_ref[...],
                preferred_element_type=jnp.float32) + b1_ref[...].astype(jnp.float32)
    h = 0.5 * h * (1.0 + jax.lax.erf(h * jnp.float32(_INV_SQRT2)))    # exact-erf GELU
    y = jnp.dot(h.astype(jnp.bfloat16), w2_ref[...],
                preferred_element_type=jnp.float32) + b2_ref[...].astype(jnp.float32)
    o_ref[...] = (y + x).astype(o_ref.dtype)                          # ff(x) + x


def _layernorm_kernel(x_ref, g_ref, b_ref, o_ref, *, eps):
    x = x_ref[...].astype(jnp.float32)
    o_ref[...] = _layernorm(x, g_ref[...].astype(jnp.float32),
                            b_ref[...].astype(jnp.float32), eps).astype(o_ref.dtype)


# --------------------------------------------------------------------------- wrappers
def attention_layer(x2, ap, *, batch, seq, num_heads, d_model, eps):
    m, e = x2.shape
    h = num_heads * d_model
    # TODO(synk): mask padded keys if `seq` ever stops being a multiple of 8.
    row_spec = pl.BlockSpec((seq, e), lambda i: (i, 0))
    return pl.pallas_call(
        functools.partial(_attn_layer_kernel, num_heads=num_heads, d_model=d_model,
                          scale=d_model ** -0.5, eps=eps),
        out_shape=jax.ShapeDtypeStruct((m, e), jnp.float32),
        grid=(batch,),
        in_specs=[row_spec,
                  _const_spec((1, e)), _const_spec((1, e)),
                  _const_spec((e, 3 * h)), _const_spec((h, e))],
        out_specs=row_spec,
        compiler_params=_compiler_params(1),
        cost_estimate=pl.CostEstimate(
            flops=2 * m * e * 3 * h + 4 * m * seq * h + 2 * m * h * e,
            transcendentals=m * seq * num_heads,
            bytes_accessed=8 * m * e + 2 * e * 3 * h + 2 * h * e),
    )(x2, ap["ln_gamma"].reshape(1, e), ap["ln_beta"].reshape(1, e),
      ap["w_qkv"], ap["w_out"])


def feedforward_residual(x2, ffp, *, eps, tm_max=256):
    # TODO(synk): for ViT-Base on v7x (64 MiB VMEM), add a grid axis over the hidden
    # dim with an f32 accumulator scratch instead of shrinking the row tile.
    m, e = x2.shape
    hdim = ffp["w1"].shape[1]
    tm = _choose_tm(m, tm_max)
    m_pad = pl.cdiv(m, tm) * tm
    out = pl.pallas_call(
        functools.partial(_ffn_kernel, eps=eps),
        out_shape=jax.ShapeDtypeStruct((m_pad, e), jnp.float32),
        grid=(m_pad // tm,),
        in_specs=[_row_spec(tm, e),
                  _const_spec((1, e)), _const_spec((1, e)),
                  _const_spec((e, hdim)), _const_spec((1, hdim)),
                  _const_spec((hdim, e)), _const_spec((1, e))],
        out_specs=_row_spec(tm, e),
        compiler_params=_compiler_params(1),
        cost_estimate=pl.CostEstimate(
            flops=4 * m_pad * e * hdim,
            transcendentals=m_pad * hdim,
            bytes_accessed=8 * m_pad * e + 4 * e * hdim),
    )(_pad_rows(x2, m_pad),
      ffp["ln_gamma"].reshape(1, e), ffp["ln_beta"].reshape(1, e),
      ffp["w1"], ffp["b1"].reshape(1, hdim),
      ffp["w2"], ffp["b2"].reshape(1, e))
    return out[:m]


def layernorm(x2, gamma, beta, *, eps, tm_max=256):
    m, e = x2.shape
    tm = _choose_tm(m, tm_max)
    m_pad = pl.cdiv(m, tm) * tm
    out = pl.pallas_call(
        functools.partial(_layernorm_kernel, eps=eps),
        out_shape=jax.ShapeDtypeStruct((m_pad, e), jnp.float32),
        grid=(m_pad // tm,),
        in_specs=[_row_spec(tm, e), _const_spec((1, e)), _const_spec((1, e))],
        out_specs=_row_spec(tm, e),
        compiler_params=_compiler_params(1),
    )(_pad_rows(x2, m_pad), gamma.reshape(1, e), beta.reshape(1, e))
    return out[:m]


def transformer_forward(x, params, *, num_heads, d_model, eps=1e-5):
    b, n, e = x.shape
    x2 = x.reshape(b * n, e)                  # residual stream stays (M, E) f32 throughout
    for layer in params["layers"]:
        x2 = attention_layer(x2, layer["attn"], batch=b, seq=n,
                             num_heads=num_heads, d_model=d_model, eps=eps)
        x2 = feedforward_residual(x2, layer["ff"], eps=eps)
    x2 = layernorm(x2, params["final_ln"]["gamma"], params["final_ln"]["beta"], eps=eps)
    return x2.reshape(b, n, e)


# --------------------------------------------------------------------------- params / reference
def init_transformer_params(key, embedding_dim, hidden_dim, num_heads, d_model, depth=2):
    e, hf = embedding_dim, hidden_dim
    h = num_heads * d_model
    lim_e, lim_h, lim_hf = 1.0 / e ** 0.5, 1.0 / h ** 0.5, 1.0 / hf ** 0.5
    layers = []
    for _ in range(depth):
        key, k1, k2, k3, k4, k5, k6 = jax.random.split(key, 7)
        attn = {
            "ln_gamma": jnp.ones((e,), jnp.float32),
            "ln_beta": jnp.zeros((e,), jnp.float32),
            # stored (in, out); bf16 weights = MXU-native operands, half the VMEM/HBM
            "w_qkv": jax.random.uniform(k1, (e, 3 * h), jnp.float32, -lim_e, lim_e).astype(jnp.bfloat16),
            "w_out": jax.random.uniform(k2, (h, e), jnp.float32, -lim_h, lim_h).astype(jnp.bfloat16),
        }
        ff = {
            "ln_gamma": jnp.ones((e,), jnp.float32),
            "ln_beta": jnp.zeros((e,), jnp.float32),
            "w1": jax.random.uniform(k3, (e, hf), jnp.float32, -lim_e, lim_e).astype(jnp.bfloat16),
            "b1": jax.random.uniform(k4, (hf,), jnp.float32, -lim_e, lim_e),
            "w2": jax.random.uniform(k5, (hf, e), jnp.float32, -lim_hf, lim_hf).astype(jnp.bfloat16),
            "b2": jax.random.uniform(k6, (e,), jnp.float32, -lim_hf, lim_hf),
        }
        layers.append({"attn": attn, "ff": ff})
    return {"layers": layers,
            "final_ln": {"gamma": jnp.ones((e,), jnp.float32),
                         "beta": jnp.zeros((e,), jnp.float32)}}


def transformer_ref(x, params, *, num_heads, d_model, eps=1e-5):
    def ln(t, g, b):
        m = jnp.mean(t, axis=-1, keepdims=True)
        v = jnp.mean((t - m) ** 2, axis=-1, keepdims=True)
        return (t - m) * jax.lax.rsqrt(v + eps) * g + b

    def mm(a, w):  # mirror kernel precision: bf16 operands, f32 accumulation
        return jnp.einsum("...i,io->...o", a.astype(jnp.bfloat16), w,
                          preferred_element_type=jnp.float32)

    bsz, n, _ = x.shape
    h = num_heads * d_model
    for layer in params["layers"]:
        a, f = layer["attn"], layer["ff"]
        xn = ln(x, a["ln_gamma"], a["ln_beta"])
        q, k, v = jnp.split(mm(xn, a["w_qkv"]), 3, axis=-1)

        def to_heads(t):
            return t.reshape(bsz, n, num_heads, d_model).transpose(0, 2, 1, 3)

        q, k, v = to_heads(q), to_heads(k), to_heads(v)
        s = jnp.einsum("bhnd,bhmd->bhnm", q.astype(jnp.bfloat16), k.astype(jnp.bfloat16),
                       preferred_element_type=jnp.float32) * (d_model ** -0.5)
        p = jax.nn.softmax(s, axis=-1)
        o = jnp.einsum("bhnm,bhmd->bhnd", p.astype(jnp.bfloat16), v.astype(jnp.bfloat16),
                       preferred_element_type=jnp.float32)
        o = o.transpose(0, 2, 1, 3).reshape(bsz, n, h)
        x = mm(o, a["w_out"]) + x

        xn = ln(x, f["ln_gamma"], f["ln_beta"])
        hh = mm(xn, f["w1"]) + f["b1"]
        hh = 0.5 * hh * (1.0 + jax.lax.erf(hh * jnp.float32(_INV_SQRT2)))
        x = mm(hh, f["w2"]) + f["b2"] + x
    return ln(x, params["final_ln"]["gamma"], params["final_ln"]["beta"])


if __name__ == "__main__":
    key = jax.random.PRNGKey(0)
    kx, kp = jax.random.split(key)

    B, N = 2, 16                  # batch, sequence length
    E, HIDDEN = 128, 256          # lane-dense embedding / MLP hidden dims
    NUM_HEADS, D_MODEL = 2, 128   # head dim = 128 so per-head slices/stores are lane-dense

    x = jax.random.normal(kx, (B, N, E), jnp.float32)
    params = init_transformer_params(kp, E, HIDDEN, NUM_HEADS, D_MODEL)

    out = transformer_forward(x, params, num_heads=NUM_HEADS, d_model=D_MODEL)
    out = jax.block_until_ready(out)

    ref = transformer_ref(x, params, num_heads=NUM_HEADS, d_model=D_MODEL)
    assert out.shape == (B, N, E)
    assert jnp.allclose(out, ref, atol=2e-2, rtol=2e-2), "mismatch vs reference"

    print("KERNEL_OK")
</pallas_src>

<mosaic_0001>
module attributes {stable_mosaic.version = 11 : i64} {
  func.func @_attn_layer_kernel(%arg0: i32, %arg1: memref<16x128xf32, #tpu.memory_space<vmem>>, %arg2: memref<1x128xf32, #tpu.memory_space<vmem>>, %arg3: memref<1x128xf32, #tpu.memory_space<vmem>>, %arg4: memref<128x768xbf16, #tpu.memory_space<vmem>>, %arg5: memref<256x128xbf16, #tpu.memory_space<vmem>>, %arg6: memref<16x128xf32, #tpu.memory_space<vmem>>) attributes {dimension_semantics = [#tpu.dimension_semantics<parallel>], iteration_bounds = array<i64: 2>, scalar_prefetch = 0 : i64, scratch_operands = 0 : i64, tpu.core_type = #tpu.core_type<tc>, window_params = [{transform_indices = @transform_0, window_bounds = array<i64: 16, 128>}, {pipeline_mode = #tpu.pipeline_mode<synchronous>, transform_indices = @transform_1, window_bounds = array<i64: 1, 128>}, {pipeline_mode = #tpu.pipeline_mode<synchronous>, transform_indices = @transform_2, window_bounds = array<i64: 1, 128>}, {pipeline_mode = #tpu.pipeline_mode<synchronous>, transform_indices = @transform_3, window_bounds = array<i64: 128, 768>}, {pipeline_mode = #tpu.pipeline_mode<synchronous>, transform_indices = @transform_4, window_bounds = array<i64: 256, 128>}, {transform_indices = @transform_5, window_bounds = array<i64: 16, 128>}]} {
    %c0 = arith.constant 0 : index
    %c0_0 = arith.constant 0 : index
    %0 = vector.load %arg1[%c0, %c0_0] : memref<16x128xf32, #tpu.memory_space<vmem>>, vector<16x128xf32>
    %c0_1 = arith.constant 0 : index
    %c0_2 = arith.constant 0 : index
    %1 = vector.load %arg2[%c0_1, %c0_2] : memref<1x128xf32, #tpu.memory_space<vmem>>, vector<1x128xf32>
    %c0_3 = arith.constant 0 : index
    %c0_4 = arith.constant 0 : index
    %2 = vector.load %arg3[%c0_3, %c0_4] : memref<1x128xf32, #tpu.memory_space<vmem>>, vector<1x128xf32>
    %cst = arith.constant dense<0.000000e+00> : vector<16xf32>
    %3 = vector.multi_reduction <add>, %0, %cst [1] : vector<16x128xf32> to vector<16xf32>
    %4 = vector.shape_cast %3 : vector<16xf32> to vector<16x1xf32>
    %cst_5 = arith.constant 1.280000e+02 : f32
    %5 = vector.broadcast %cst_5 : f32 to vector<16x1xf32>
    %6 = arith.divf %4, %5 : vector<16x1xf32>
    %7 = vector.broadcast %6 : vector<16x1xf32> to vector<16x128xf32>
    %8 = arith.subf %0, %7 : vector<16x128xf32>
    %9 = arith.mulf %8, %8 : vector<16x128xf32>
    %cst_6 = arith.constant dense<0.000000e+00> : vector<16xf32>
    %10 = vector.multi_reduction <add>, %9, %cst_6 [1] : vector<16x128xf32> to vector<16xf32>
    %11 = vector.shape_cast %10 : vector<16xf32> to vector<16x1xf32>
    %cst_7 = arith.constant 1.280000e+02 : f32
    %12 = vector.broadcast %cst_7 : f32 to vector<16x1xf32>
    %13 = arith.divf %11, %12 : vector<16x1xf32>
    %cst_8 = arith.constant 9.99999974E-6 : f32
    %14 = vector.broadcast %cst_8 : f32 to vector<16x1xf32>
    %15 = arith.addf %13, %14 : vector<16x1xf32>
    %16 = math.rsqrt %15 : vector<16x1xf32>
    %17 = vector.broadcast %16 : vector<16x1xf32> to vector<16x128xf32>
    %18 = arith.mulf %8, %17 : vector<16x128xf32>
    %19 = vector.broadcast %1 : vector<1x128xf32> to vector<16x128xf32>
    %20 = arith.mulf %18, %19 : vector<16x128xf32>
    %21 = vector.broadcast %2 : vector<1x128xf32> to vector<16x128xf32>
    %22 = arith.addf %20, %21 : vector<16x128xf32>
    %23 = arith.truncf %22 : vector<16x128xf32> to vector<16x128xbf16>
    %c0_9 = arith.constant 0 : index
    %c0_10 = arith.constant 0 : index
    %24 = vector.load %arg4[%c0_9, %c0_10] : memref<128x768xbf16, #tpu.memory_space<vmem>>, vector<128x768xbf16>
    %cst_11 = arith.constant dense<0.000000e+00> : vector<16x768xf32>
    %25 = tpu.matmul %23, %24, %cst_11 {dimension_numbers = #tpu.dot_dimension_numbers<[1], [0], [0], [1], [0, 0, 1, 1], [], []>} : vector<16x128xbf16>, vector<128x768xbf16>, vector<16x768xf32> -> vector<16x768xf32>
    %26 = arith.truncf %25 : vector<16x768xf32> to vector<16x768xbf16>
    %27 = vector.extract_strided_slice %26 {offsets = [0, 0], sizes = [16, 128], strides = [1, 1]} : vector<16x768xbf16> to vector<16x128xbf16>
    %28 = vector.extract_strided_slice %26 {offsets = [0, 256], sizes = [16, 128], strides = [1, 1]} : vector<16x768xbf16> to vector<16x128xbf16>
    %29 = vector.extract_strided_slice %26 {offsets = [0, 512], sizes = [16, 128], strides = [1, 1]} : vector<16x768xbf16> to vector<16x128xbf16>
    %cst_12 = arith.constant dense<0.000000e+00> : vector<16x16xf32>
    %30 = tpu.matmul %27, %28, %cst_12 {dimension_numbers = #tpu.dot_dimension_numbers<[1], [1], [0], [0], [0, 0, 1, 0], [], []>} : vector<16x128xbf16>, vector<16x128xbf16>, vector<16x16xf32> -> vector<16x16xf32>
    %cst_13 = arith.constant 0.0883883461 : f32
    %31 = vector.broadcast %cst_13 : f32 to vector<16x16xf32>
    %32 = arith.mulf %30, %31 : vector<16x16xf32>
    %cst_14 = arith.constant dense<0xFF800000> : vector<16xf32>
    %33 = vector.multi_reduction <maximumf>, %32, %cst_14 [1] : vector<16x16xf32> to vector<16xf32>
    %34 = vector.shape_cast %33 : vector<16xf32> to vector<16x1xf32>
    %35 = vector.broadcast %34 : vector<16x1xf32> to vector<16x16xf32>
    %36 = arith.subf %32, %35 : vector<16x16xf32>
    %37 = math.exp %36 : vector<16x16xf32>
    %cst_15 = arith.constant dense<0.000000e+00> : vector<16xf32>
    %38 = vector.multi_reduction <add>, %37, %cst_15 [1] : vector<16x16xf32> to vector<16xf32>
    %39 = vector.shape_cast %38 : vector<16xf32> to vector<16x1xf32>
    %40 = tpu.reciprocal %39 {approx = true} : vector<16x1xf32> -> vector<16x1xf32>
    %41 = vector.broadcast %40 : vector<16x1xf32> to vector<16x16xf32>
    %42 = arith.mulf %37, %41 : vector<16x16xf32>
    %43 = arith.truncf %42 : vector<16x16xf32> to vector<16x16xbf16>
    %cst_16 = arith.constant dense<0.000000e+00> : vector<16x128xf32>
    %44 = tpu.matmul %43, %29, %cst_16 {dimension_numbers = #tpu.dot_dimension_numbers<[1], [0], [0], [1], [0, 0, 1, 1], [], []>} : vector<16x16xbf16>, vector<16x128xbf16>, vector<16x128xf32> -> vector<16x128xf32>
    %45 = arith.truncf %44 : vector<16x128xf32> to vector<16x128xbf16>
    %c0_17 = arith.constant 0 : index
    %c0_18 = arith.constant 0 : index
    %46 = vector.load %arg5[%c0_17, %c0_18] : memref<256x128xbf16, #tpu.memory_space<vmem>>, vector<128x128xbf16>
    %cst_19 = arith.constant dense<0.000000e+00> : vector<16x128xf32>
    %47 = tpu.matmul %45, %46, %cst_19 {dimension_numbers = #tpu.dot_dimension_numbers<[1], [0], [0], [1], [0, 0, 1, 1], [], []>} : vector<16x128xbf16>, vector<128x128xbf16>, vector<16x128xf32> -> vector<16x128xf32>
    %48 = arith.addf %0, %47 : vector<16x128xf32>
    %49 = vector.extract_strided_slice %26 {offsets = [0, 128], sizes = [16, 128], strides = [1, 1]} : vector<16x768xbf16> to vector<16x128xbf16>
    %50 = vector.extract_strided_slice %26 {offsets = [0, 384], sizes = [16, 128], strides = [1, 1]} : vector<16x768xbf16> to vector<16x128xbf16>
    %51 = vector.extract_strided_slice %26 {offsets = [0, 640], sizes = [16, 128], strides = [1, 1]} : vector<16x768xbf16> to vector<16x128xbf16>
    %cst_20 = arith.constant dense<0.000000e+00> : vector<16x16xf32>
    %52 = tpu.matmul %49, %50, %cst_20 {dimension_numbers = #tpu.dot_dimension_numbers<[1], [1], [0], [0], [0, 0, 1, 0], [], []>} : vector<16x128xbf16>, vector<16x128xbf16>, vector<16x16xf32> -> vector<16x16xf32>
    %cst_21 = arith.constant 0.0883883461 : f32
    %53 = vector.broadcast %cst_21 : f32 to vector<16x16xf32>
    %54 = arith.mulf %52, %53 : vector<16x16xf32>
    %cst_22 = arith.constant dense<0xFF800000> : vector<16xf32>
    %55 = vector.multi_reduction <maximumf>, %54, %cst_22 [1] : vector<16x16xf32> to vector<16xf32>
    %56 = vector.shape_cast %55 : vector<16xf32> to vector<16x1xf32>
    %57 = vector.broadcast %56 : vector<16x1xf32> to vector<16x16xf32>
    %58 = arith.subf %54, %57 : vector<16x16xf32>
    %59 = math.exp %58 : vector<16x16xf32>
    %cst_23 = arith.constant dense<0.000000e+00> : vector<16xf32>
    %60 = vector.multi_reduction <add>, %59, %cst_23 [1] : vector<16x16xf32> to vector<16xf32>
    %61 = vector.shape_cast %60 : vector<16xf32> to vector<16x1xf32>
    %62 = tpu.reciprocal %61 {approx = true} : vector<16x1xf32> -> vector<16x1xf32>
    %63 = vector.broadcast %62 : vector<16x1xf32> to vector<16x16xf32>
    %64 = arith.mulf %59, %63 : vector<16x16xf32>
    %65 = arith.truncf %64 : vector<16x16xf32> to vector<16x16xbf16>
    %cst_24 = arith.constant dense<0.000000e+00> : vector<16x128xf32>
    %66 = tpu.matmul %65, %51, %cst_24 {dimension_numbers = #tpu.dot_dimension_numbers<[1], [0], [0], [1], [0, 0, 1, 1], [], []>} : vector<16x16xbf16>, vector<16x128xbf16>, vector<16x128xf32> -> vector<16x128xf32>
    %67 = arith.truncf %66 : vector<16x128xf32> to vector<16x128xbf16>
    %c128 = arith.constant 128 : index
    %c0_25 = arith.constant 0 : index
    %68 = vector.load %arg5[%c128, %c0_25] : memref<256x128xbf16, #tpu.memory_space<vmem>>, vector<128x128xbf16>
    %cst_26 = arith.constant dense<0.000000e+00> : vector<16x128xf32>
    %69 = tpu.matmul %67, %68, %cst_26 {dimension_numbers = #tpu.dot_dimension_numbers<[1], [0], [0], [1], [0, 0, 1, 1], [], []>} : vector<16x128xbf16>, vector<128x128xbf16>, vector<16x128xf32> -> vector<16x128xf32>
    %70 = arith.addf %48, %69 : vector<16x128xf32>
    %c0_27 = arith.constant 0 : index
    %c0_28 = arith.constant 0 : index
    %71 = vector.load %arg6[%c0_27, %c0_28] : memref<16x128xf32, #tpu.memory_space<vmem>>, vector<16x128xf32>
    tpu.vector_store %arg6[%c0_27, %c0_28], %70 {strides = array<i32>} : memref<16x128xf32, #tpu.memory_space<vmem>>, vector<16x128xf32>,
    return
  }
  func.func @transform_0(%arg0: i32) -> (i32, i32) {
    %c0_i32 = arith.constant 0 : i32
    %c0_i32_0 = arith.constant 0 : i32
    return %arg0, %c0_i32 : i32, i32
  }
  func.func @transform_1(%arg0: i32) -> (i32, i32) {
    %c0_i32 = arith.constant 0 : i32
    %c0_i32_0 = arith.constant 0 : i32
    %c0_i32_1 = arith.constant 0 : i32
    return %c0_i32, %c0_i32_0 : i32, i32
  }
  func.func @transform_2(%arg0: i32) -> (i32, i32) {
    %c0_i32 = arith.constant 0 : i32
    %c0_i32_0 = arith.constant 0 : i32
    %c0_i32_1 = arith.constant 0 : i32
    return %c0_i32, %c0_i32_0 : i32, i32
  }
  func.func @transform_3(%arg0: i32) -> (i32, i32) {
    %c0_i32 = arith.constant 0 : i32
    %c0_i32_0 = arith.constant 0 : i32
    %c0_i32_1 = arith.constant 0 : i32
    return %c0_i32, %c0_i32_0 : i32, i32
  }
  func.func @transform_4(%arg0: i32) -> (i32, i32) {
    %c0_i32 = arith.constant 0 : i32
    %c0_i32_0 = arith.constant 0 : i32
    %c0_i32_1 = arith.constant 0 : i32
    return %c0_i32, %c0_i32_0 : i32, i32
  }
  func.func @transform_5(%arg0: i32) -> (i32, i32) {
    %c0_i32 = arith.constant 0 : i32
    %c0_i32_0 = arith.constant 0 : i32
    return %arg0, %c0_i32 : i32, i32
  }
}

</mosaic_0001>

<bundles_post_ra>
// kernel: tpu_custom_call.1
= control target key start
LH: loop header
LB: loop body
LE: loop exit
PB: predicated region body
PF: predicated region fallthrough
CT: control target
= control target key end

     0   :  { %10 = vsyncpa [#allocation3], 0  ;;  %s2190_s0 = inlined_call_operand.hbm [shape: f32[32,128], index: 0, kind: input, shape index: {}]   ;;  %s2191_s1 = inlined_call_operand.vmem [shape: f32[1,128], index: 1, kind: input, shape index: {}]   ;;  %s2192_s2 = inlined_call_operand.vmem [shape: f32[1,128], index: 2, kind: input, shape index: {}]   ;;  %s2193_s3 = inlined_call_operand.hbm [shape: bf16[128,768], index: 3, kind: input, shape index: {}]   ;;  %s2194_s4 = inlined_call_operand.hbm [shape: bf16[256,128], index: 4, kind: input, shape index: {}]   ;;  %s2195_s5 = inlined_call_operand.hbm [shape: f32[32,128], index: 5, kind: output, shape index: {}]  }
   0x1   :  { %12 = vsyncpa [#allocation3 + $0x1], 0 }
   0x2   :  { %13 = vsyncpa [#allocation6], 0 }
   0x3   :  { %14 = vsyncpa [#allocation4], 0 }
   0x4   :  { %16 = vsyncpa [#allocation4 + $0x1], 0  ;;  %s1860_s18 = smov 0   ;;  %s1862_s19 = smov 0  }
   0x5   :  { %s1864_s20 = smov 0   ;;  %s1866_s21 = smov 0  }
   0x6 LB: > { %s1881_s22 = sadd.s32 4294967295, %s1813_s21   ;;  %s1287_s23 = sadd.s32 4294967294, %s1813_s21   ;;  %s1813_s21 = sphi %s1866_s21, %s2215_s21   ;;  %s1809_s20 = sphi %s1864_s20, %s2214_s20   ;;  %s1805_s19 = sphi %s1862_s19, %s2213_s19   ;;  %s1801_s18 = sphi %s1860_s18, %s2212_s18  }
   0x7   : > { %p42_p0 = scmp.ne.s32.totalorder %s1805_s19, %s1801_s18  ;;  %p2196_p1 = scmp.eq.s32.totalorder %s1881_s22, 0 }
   0x8   : > { %p156_p3 = scmp.eq.s32.totalorder %s1287_s23, 1  ;;  %p1288_p5 = scmp.ge.s32.totalorder %s1813_s21, 1 }
   0x9   : > { %p1890_p4 = por %p2196_p1, %p42_p0  ;;  %p163_p7 = scmp.lt.s32.totalorder %s1813_s21, 3 }
   0xa   : > { %p1895_p6 = por %p156_p3, %p42_p0  ;;  %s1815_s27 = smov [#allocation5]  }
   0xb   : > { %s2199_s24 = scalar_select %p1890_p4, 1, 0 }
   0xc   : > { %s2200_s25 = scalar_select %p1895_p6, 1, 0 }
   0xd   : > { %p1900_p8 = pnand %p1288_p5, %p163_p7  ;;  %s181_s28 = sshll.u32 %s1815_s27, 4  ;;  %s1904_s28 = int_to_ptr.vmem [resolvable:$true] %s181_s28 }
   0xe   : > { %s1816_s30 = smov [#allocation7]   ;;  %s1657_s9 = scalar_lea.hbm %s2193_s3, 6144 }
   0xf   : > { %p1483_p9 = pneg %p1900_p8  ;;  %s194_s6 = sshll.u32 %s1816_s30, 4  ;;  %s1915_s6 = int_to_ptr.vmem [resolvable:$true] %s194_s6 }
  0x10   : > { %p1658_p12 = scmp.ne.s32.totalorder %s2193_s3, %s1657_s9  ;;  %p1664_p5 = scmp.lt.u32.totalorder %s1657_s9, %s2193_s3 }
  0x11   : > { %p1911_p11 = pnand %p1483_p9, %p2196_p1 }
  0x13   : > { %p1659_p13 = pneg %p1911_p11 }
  0x15   : > { %p1660_p0 = pnand %p1659_p13, %p1658_p12 }
  0x17   : > { %p1661_p3 = pneg %p1660_p0 }
  0x19   : > { %p1666_p7 = pnand %p1664_p5, %p1661_p3 }
  0x1b   : > { %1669 = shalt.err (!%p1666_p7)
}
  0x1c   : > { %s1670_s14 = scalar_lea.vmem %s1904_s28, 6144  ;;  %p1678_p2 = scmp.lt.s32.totalorder %s1904_s28, %s1904_s28 }
  0x1d   : > { %p1671_p9 = scmp.ne.s32.totalorder %s1904_s28, %s1670_s14  ;;  %p1679_p12 = scmp.lt.s32.totalorder %s1670_s14, %s1670_s14 }
  0x1f   : > { %p1673_p10 = pnand %p1671_p9, %p1659_p13  ;;  %p1680_p0 = por %p1679_p12, %p1678_p2 }
  0x21   : > { %p1674_p1 = pneg %p1673_p10 }
  0x23   : > { %p1681_p6 = pnand %p1680_p0, %p1674_p1 }
  0x25   : > { %1684 = shalt.err (!%p1681_p6)
}
  0x26   : > { %s1817_s15 = smov 384   ;;  %s1818_s16 = smov 24  }
  0x27   : > { %1486 = dma.hbm_to_vmem [thread:$0]  (!%p1911_p11), %s2193_s3, 6144, %s1904_s28, [#allocation6], %s1817_s15, %s1817_s15, %s1818_s16  }
  0x28   : > { %s1685_s7 = scalar_lea.hbm %s2194_s4, 2048 }
  0x29   : > { %p1686_p2 = scmp.ne.s32.totalorder %s2194_s4, %s1685_s7  ;;  %p1692_p10 = scmp.lt.u32.totalorder %s1685_s7, %s2194_s4 }
  0x2b   : > { %p1688_p1 = pnand %p1686_p2, %p1659_p13 }
  0x2d   : > { %p1689_p6 = pneg %p1688_p1 }
  0x2f   : > { %p1694_p3 = pnand %p1692_p10, %p1689_p6 }
  0x31   : > { %1697 = shalt.err (!%p1694_p3)
}
  0x32   : > { %s1698_s28 = scalar_lea.vmem %s1915_s6, 2048  ;;  %p1706_p12 = scmp.lt.s32.totalorder %s1915_s6, %s1915_s6 }
  0x33   : > { %p1699_p5 = scmp.ne.s32.totalorder %s1915_s6, %s1698_s28  ;;  %p1707_p0 = scmp.lt.s32.totalorder %s1698_s28, %s1698_s28 }
  0x35   : > { %p1701_p7 = pnand %p1699_p5, %p1659_p13  ;;  %p1708_p2 = por %p1707_p0, %p1706_p12 }
  0x37   : > { %p1702_p9 = pneg %p1701_p7 }
  0x39   : > { %p1709_p1 = pnand %p1708_p2, %p1702_p9 }
  0x3b   : > { %1712 = shalt.err (!%p1709_p1)
}
  0x3c   : > { %s1819_s12 = smov 64   ;;  %s1820_s13 = smov 4  }
  0x3d   : > { %1489 = dma.hbm_to_vmem [thread:$0]  (!%p1911_p11), %s2194_s4, 2048, %s1915_s6, [#allocation6], %s1819_s12, %s1819_s12, %s1820_s13  }
  0x3e   : > { %s1970_s16 = sadd.s32 1, %s1813_s21   ;;  %s29_s23 = sadd.s32 1, %s1809_s20 }
  0x3f   : > { %s26_s17 = ssub.s32 %s1813_s21, %s1970_s16  ;;  %p36_p6 = scmp.ne.s32.totalorder %s1809_s20, %s1805_s19 }
  0x40   : > { %p27_p13 = scmp.eq.s32.totalorder %s26_s17, 0  ;;  %p37_p10 = scmp.eq.s32.totalorder %s1813_s21, 0 }
  0x41   : > { %p2203_p5 = scmp.eq.s32.totalorder %s1881_s22, 1  ;;  %p1500_p9 = scmp.lt.s32.totalorder %s1813_s21, 2 }
  0x42   : > { %s1979_s27 = scalar_select %p27_p13, %s1809_s20, %s29_s23  }
  0x43   : > { %p38_p3 = por %p37_p10, %p36_p6  ;;  %p1983_p7 = por %p2203_p5, %p36_p6 }
  0x44   : > { %s208_s29 = sand.u32 1, %s1809_s20   ;;  %s1373_s6 = sshll.u32 %s1813_s21, 8 }
  0x45   : > { %s2204_s30 = scalar_select %p1983_p7, 1, 0 }
  0x46   : > { %s1292_s7 = sshll.u32 %s208_s29, 4  ;;  %s1993_s10 = scalar_lea.hbm %s2190_s0, %s1373_s6 }
  0x47   : > { %s212_s11 = scalar_lea.vmem [#allocation2], %s1292_s7  ;;  %p1997_p11 = pnand %p1500_p9, %p38_p3 }
  0x48   : > { %s219_s28 = sshll.u32 %s212_s11, 4  ;;  %s2001_s13 = scalar_lea.sflag [#allocation3], %s208_s29  ;;  %s1995_s28 = int_to_ptr.vmem [resolvable:$true] %s219_s28 }
  0x49   : > { %s1713_s14 = scalar_lea.hbm %s1993_s10, 256  ;;  %p1715_p0 = pneg %p1997_p11 }
  0x4a   : > { %p1714_p12 = scmp.ne.s32.totalorder %s1993_s10, %s1713_s14  ;;  %s1718_s23 = scalar_lea.hbm %s2190_s0, 512 }
  0x4b   : > { %p1719_p13 = scmp.lt.u32.totalorder %s1993_s10, %s2190_s0  ;;  %p1720_p6 = scmp.lt.u32.totalorder %s1718_s23, %s1713_s14 }
  0x4c   : > { %p1716_p2 = pnand %p1715_p0, %p1714_p12  ;;  %p1722_p3 = scmp.lt.u32.totalorder %s1713_s14, %s1993_s10 }
  0x4d   : > { %p1721_p10 = por %p1720_p6, %p1719_p13 }
  0x4e   : > { %p1717_p1 = pneg %p1716_p2 }
  0x4f   : > { %p1723_p5 = por %p1722_p3, %p1721_p10 }
  0x51   : > { %p1724_p9 = pnand %p1723_p5, %p1717_p1 }
  0x53   : > { %1727 = shalt.err (!%p1724_p9)
}
  0x54   : > { %s1728_s29 = scalar_lea.vmem %s1995_s28, 256  ;;  %s1821_s8 = smov [#allocation2]  }
  0x55   : > { %p1729_p12 = scmp.ne.s32.totalorder %s1995_s28, %s1728_s29  ;;  %s1733_s9 = sshll.u32 %s1821_s8, 4  ;;  %s1734_s9 = int_to_ptr.vmem [resolvable:$false] %s1733_s9 }
  0x56   : > { %s1735_s11 = scalar_lea.vmem %s1734_s9, 512  ;;  %p1736_p4 = scmp.lt.s32.totalorder %s1995_s28, %s1734_s9 }
  0x57   : > { %p1731_p2 = pnand %p1729_p12, %p1715_p0  ;;  %p1737_p13 = scmp.lt.s32.totalorder %s1735_s11, %s1728_s29 }
  0x59   : > { %p1732_p7 = pneg %p1731_p2  ;;  %p1738_p6 = por %p1737_p13, %p1736_p4 }
  0x5b   : > { %p1739_p10 = pnand %p1738_p6, %p1732_p7 }
  0x5d   : > { %1742 = shalt.err (!%p1739_p10)
}
  0x5e   : > { %s1822_s14 = smov 128   ;;  %s1823_s15 = smov 8  }
  0x5f   : > { %1493 = dma.hbm_to_vmem [thread:$0]  (!%p1997_p11), %s1993_s10, 256, %s1995_s28, %s2001_s13, %s1822_s14, %s1822_s14, %s1823_s15  }
  0x60   : > { %231 = sbr.rel (%p1900_p8) target bundleno = 2167 (0x877), region = 40  ;;  %s2032_s17 = sand.u32 (!%p1900_p8), 1, %s1805_s19  }
  0x61   : > { %s1296_s23 = sshll.u32 (!%p1900_p8), %s2032_s17, 4  ;;  %s234_s7 = scalar_lea.sflag (!%p1900_p8), [#allocation3], %s2032_s17 }
  0x62   : > { %s237_s6 = scalar_lea.vmem (!%p1900_p8), [#allocation2], %s1296_s23  ;;  %p2206_p4 = scmp.ne.s32.totalorder (!%p1900_p8), %s2199_s24, 0 }
  0x67   : > { %1788 = dma.done.wait (%p2206_p4), %s234_s7, 256  }
  0x68   : > { %1790 = vsyncadd (%p2206_p4), %s234_s7, 4294967040  ;;  %p2207_p7 = scmp.eq.s32.totalorder %s1881_s22, 0 }
  0x6a   : > { %1792 = dma.done.wait (%p2207_p7), [#allocation6], 8192   ;;  %p2208_p8 = pmov %p2207_p7 }
  0x6b   : > { %v2046_v0 = vld [vmem:[%s237_s6] sm:$0xff]  ;;  %v2048_v1 = vld [vmem:[%s237_s6 + $0x8] sm:$0xff]  ;;  %v1824_v36 = vmov 0   ;;  %vm1826_vm0 = vmmov 0   ;;  %vm785_vm1 = vcmask 130048   ;;  %s271_s12 = scalar_lea.vmem [#allocation8], %s1296_s23 }
  0x6c   : > { %1794 = vsyncadd (%p2208_p8), [#allocation6], 4294959104  ;;  %279 = vadd.xlane.f32.xlu0 %v2046_v0  ;;  %v1549_v2 = vld [vmem:[#allocation5 + $0x4] ss:$24 sps:$4 sm:$0xff]   ;;  %v1551_v3 = vld [vmem:[#allocation5] ss:$24 sps:$4 sm:$0xff]   ;;  %639 = vmatprep.mubr.bf16.mxu0 %v1824_v36 }
  0x6d   : > { %v1552_v4 = vld [vmem:[#allocation5 + $0xc] ss:$24 sps:$4 sm:$0xff]   ;;  %v1554_v5 = vld [vmem:[#allocation5 + $0x8] ss:$24 sps:$4 sm:$0xff]   ;;  %607 = vmatprep.subr.bf16.mxu0 %v1549_v2  ;;  %v1558_v8 = vld [vmem:[#allocation5 + $0x3c] ss:$24 sps:$4 sm:$0xff]   ;;  %682 = vmatprep.mubr.bf16.mxu1 %v1824_v36 }
  0x6e   : > { %v1555_v6 = vld [vmem:[#allocation5 + $0x34] ss:$24 sps:$4 sm:$0xff]   ;;  %v1557_v7 = vld [vmem:[#allocation5 + $0x30] ss:$24 sps:$4 sm:$0xff]   ;;  %650 = vmatprep.subr.bf16.mxu1 %v1552_v4  ;;  %608 = vmatpush1.bf16.msra.mxu0 %v1551_v3  ;;  %v1561_v18 = vld [vmem:[#allocation5 + $0x64] ss:$24 sps:$4 sm:$0xff]  }
  0x6f   : > { %651 = vmatpush1.bf16.msra.mxu1 %v1554_v5  ;;  %609 = vmatprep.subr.bf16.mxu0 %v1555_v6  ;;  %v1560_v17 = vld [vmem:[#allocation5 + $0x38] ss:$24 sps:$4 sm:$0xff]   ;;  %v1564_v20 = vld [vmem:[#allocation5 + $0x6c] ss:$24 sps:$4 sm:$0xff]   ;;  %v1566_v21 = vld [vmem:[#allocation5 + $0x68] ss:$24 sps:$4 sm:$0xff]  }
  0x70   : > { %281 = vadd.xlane.f32.xlu0 %v2048_v1  ;;  %652 = vmatprep.subr.bf16.mxu1 %v1558_v8  ;;  %v1563_v19 = vld [vmem:[#allocation5 + $0x60] ss:$24 sps:$4 sm:$0xff]   ;;  %v1567_v22 = vld [vmem:[#allocation5 + $0x94] ss:$24 sps:$4 sm:$0xff]   ;;  %v1569_v23 = vld [vmem:[#allocation5 + $0x90] ss:$24 sps:$4 sm:$0xff]  }
  0x71   : > { %v1570_v24 = vld [vmem:[#allocation5 + $0x9c] ss:$24 sps:$4 sm:$0xff]   ;;  %v1572_v25 = vld [vmem:[#allocation5 + $0x98] ss:$24 sps:$4 sm:$0xff]   ;;  %v1576_v28 = vld [vmem:[#allocation5 + $0xcc] ss:$24 sps:$4 sm:$0xff]  }
  0x72   : > { %610 = vmatpush1.bf16.msra.mxu0 %v1557_v7  ;;  %v1573_v26 = vld [vmem:[#allocation5 + $0xc4] ss:$24 sps:$4 sm:$0xff]   ;;  %v1575_v27 = vld [vmem:[#allocation5 + $0xc0] ss:$24 sps:$4 sm:$0xff]   ;;  %v1579_v30 = vld [vmem:[#allocation5 + $0xf4] ss:$24 sps:$4 sm:$0xff]  }
  0x73   : > { %653 = vmatpush1.bf16.msra.mxu1 %v1560_v17  ;;  %611 = vmatprep.subr.bf16.mxu0 %v1561_v18  ;;  %v1578_v29 = vld [vmem:[#allocation5 + $0xc8] ss:$24 sps:$4 sm:$0xff]   ;;  %v1582_v31 = vld [vmem:[#allocation5 + $0xfc] ss:$24 sps:$4 sm:$0xff]   ;;  %v1584_v33 = vld [vmem:[#allocation5 + $0xf8] ss:$24 sps:$4 sm:$0xff]  }
  0x74   : > { %654 = vmatprep.subr.bf16.mxu1 %v1564_v20  ;;  %v1581_v32 = vld [vmem:[#allocation5 + $0xf0] ss:$24 sps:$4 sm:$0xff]   ;;  %v1585_v34 = vld [vmem:[#allocation5 + $0x124] ss:$24 sps:$4 sm:$0xff]   ;;  %v1587_v37 = vld [vmem:[#allocation5 + $0x120] ss:$24 sps:$4 sm:$0xff]  }
  0x75   : > { %v1588_v35 = vld [vmem:[#allocation5 + $0x12c] ss:$24 sps:$4 sm:$0xff]   ;;  %v1590_v38 = vld [vmem:[#allocation5 + $0x128] ss:$24 sps:$4 sm:$0xff]   ;;  %v1594_v40 = vld [vmem:[#allocation5 + $0x15c] ss:$24 sps:$4 sm:$0xff]  }
  0x76   : > { %612 = vmatpush1.bf16.msra.mxu0 %v1563_v19  ;;  %v1591_v39 = vld [vmem:[#allocation5 + $0x154] ss:$24 sps:$4 sm:$0xff]   ;;  %v1593_v41 = vld [vmem:[#allocation5 + $0x150] ss:$24 sps:$4 sm:$0xff]   ;;  %v1300_v52 = vld [vmem:[%s2191_s1] ss:$0 sm:$0xff] }
  0x77   : > { %655 = vmatpush1.bf16.msra.mxu1 %v1566_v21  ;;  %613 = vmatprep.subr.bf16.mxu0 %v1567_v22  ;;  %v1596_v42 = vld [vmem:[#allocation5 + $0x158] ss:$24 sps:$4 sm:$0xff]   ;;  %v1599_v43 = vld [vmem:[#allocation5 + $0x14] ss:$24 sps:$4 sm:$0xff]   ;;  %v1301_v56 = vld [vmem:[%s2192_s2] ss:$0 sm:$0xff] }
  0x78   : > { %656 = vmatprep.subr.bf16.mxu1 %v1570_v24  ;;  %v1597_v60 = vld [vmem:[#allocation5 + $0x10] ss:$24 sps:$4 sm:$0xff]   ;;  %v1602_v62 = vld [vmem:[#allocation5 + $0x44] ss:$24 sps:$4 sm:$0xff]   ;;  %v1600_v63 = vld [vmem:[#allocation5 + $0x40] ss:$24 sps:$4 sm:$0xff]  }
  0x79   : > { %v1605_v2 = vld [vmem:[#allocation5 + $0x74] ss:$24 sps:$4 sm:$0xff]   ;;  %v1603_v3 = vld [vmem:[#allocation5 + $0x70] ss:$24 sps:$4 sm:$0xff]   ;;  %v1608_v4 = vld [vmem:[#allocation5 + $0xa4] ss:$24 sps:$4 sm:$0xff]  }
  0x7a   : > { %614 = vmatpush1.bf16.msra.mxu0 %v1569_v23  ;;  %v1606_v5 = vld [vmem:[#allocation5 + $0xa0] ss:$24 sps:$4 sm:$0xff]   ;;  %v1611_v6 = vld [vmem:[#allocation5 + $0xd4] ss:$24 sps:$4 sm:$0xff]   ;;  %v1609_v7 = vld [vmem:[#allocation5 + $0xd0] ss:$24 sps:$4 sm:$0xff]  }
  0x7b   : > { %657 = vmatpush1.bf16.msra.mxu1 %v1572_v25  ;;  %615 = vmatprep.subr.bf16.mxu0 %v1573_v26  ;;  %v1614_v8 = vld [vmem:[#allocation5 + $0x104] ss:$24 sps:$4 sm:$0xff]   ;;  %s1195_s13 = sshll.u32 %s271_s12, 4  ;;  %s1374_s29 = sshll.u32 %s1881_s22, 8  ;;  %s2140_s13 = int_to_ptr.vmem [resolvable:$true] %s1195_s13 }
  0x7c   : > { %658 = vmatprep.subr.bf16.mxu1 %v1576_v28  ;;  %s2145_s11 = scalar_lea.hbm %s2195_s5, %s1374_s29  ;;  %s1182_s22 = scalar_lea.sflag [#allocation4], %s2032_s17 }
  0x7d   : > { %s1743_s14 = scalar_lea.vmem %s2140_s13, 256  ;;  %p2209_p0 = scmp.ne.s32.totalorder %s2204_s30, 0 }
  0x7e   : > { %616 = vmatpush1.bf16.msra.mxu0 %v1575_v27  ;;  %p1744_p11 = scmp.ne.s32.totalorder %s2140_s13, %s1743_s14  ;;  %s1827_s15 = smov [#allocation8]  }
  0x7f   : > { %659 = vmatpush1.bf16.msra.mxu1 %v1578_v29  ;;  %617 = vmatprep.subr.bf16.mxu0 %v1579_v30  ;;  %s1747_s23 = sshll.u32 %s1827_s15, 4  ;;  %s1748_s23 = int_to_ptr.vmem [resolvable:$false] %s1747_s23 }
  0x80   : > { %660 = vmatprep.subr.bf16.mxu1 %v1582_v31  ;;  %p1745_p1 = pnand %p1744_p11, %p2209_p0  ;;  %s1749_s7 = scalar_lea.vmem %s1748_s23, 512 }
  0x81   : > { %p1750_p5 = scmp.lt.s32.totalorder %s2140_s13, %s1748_s23  ;;  %p1751_p9 = scmp.lt.s32.totalorder %s1749_s7, %s1743_s14 }
  0x82   : > { %618 = vmatpush1.bf16.msra.mxu0 %v1581_v32  ;;  %p1746_p3 = pneg %p1745_p1 }
  0x83   : > { %661 = vmatpush1.bf16.msra.mxu1 %v1584_v33  ;;  %619 = vmatprep.subr.bf16.mxu0 %v1585_v34  ;;  %p1752_p12 = por %p1751_p9, %p1750_p5 }
  0x84   : > { %662 = vmatprep.subr.bf16.mxu1 %v1588_v35 }
  0x85   : > { %p1753_p2 = pnand %p1752_p12, %p1746_p3 }
  0x86   : > { %620 = vmatpush1.bf16.msra.mxu0 %v1587_v37 }
  0x87   : > { %663 = vmatpush1.bf16.msra.mxu1 %v1590_v38  ;;  %621 = vmatprep.subr.bf16.mxu0 %v1591_v39 }
  0x88   : > { %664 = vmatprep.subr.bf16.mxu1 %v1594_v40 }
  0x8a   : > { %622 = vmatpush1.bf16.msra.mxu0 %v1593_v41 }
  0x8b   : > { %665 = vmatpush1.bf16.msra.mxu1 %v1596_v42  ;;  %693 = vmatprep.subr.bf16.mxu0 %v1599_v43 }
  0xf9   : > { %v280_v9 = vpop.xlane.xlu0 %279 }
  0xfa   : > { %v284_v10 = vmul.f32 0.0078125, %v280_v9  ;;  %v1612_v9 = vld [vmem:[#allocation5 + $0x100] ss:$24 sps:$4 sm:$0xff]  }
  0xfc   : > { %v2053_v11 = vsub.f32 %v2046_v0, %v284_v10  ;;  %v1617_v10 = vld [vmem:[#allocation5 + $0x134] ss:$24 sps:$4 sm:$0xff]  }
  0xfd   : > { %v282_v12 = vpop.xlane.xlu0 %281 }
  0xfe   : > { %v285_v13 = vmul.f32 0.0078125, %v282_v12  ;;  %v288_v14 = vmul.f32 %v2053_v11, %v2053_v11  ;;  %v1620_v12 = vld [vmem:[#allocation5 + $0x164] ss:$24 sps:$4 sm:$0xff]  }
 0x100   : > { %v2058_v15 = vsub.f32 %v2048_v1, %v285_v13  ;;  %290 = vadd.xlane.f32.xlu1 %v288_v14  ;;  %v1618_v13 = vld [vmem:[#allocation5 + $0x160] ss:$24 sps:$4 sm:$0xff]   ;;  %v1825_v14 = vmov 0.0  }
 0x101   : > { %1413 = vmatprep.subr.bf16.mxu1 %v1825_v14 }
 0x102   : > { %v289_v16 = vmul.f32 %v2058_v15, %v2058_v15 }
 0x104   : > { %292 = vadd.xlane.f32.xlu1 %v289_v16 }
 0x18d   : > { %v291_v44 = vpop.xlane.xlu1 %290 }
 0x18e   : > { %v294_v45 = vmul.f32 0.0078125, %v291_v44 }
 0x190   : > { %v296_v46 = vadd.f32 1e-05, %v294_v45 }
 0x191   : > { %v293_v47 = vpop.xlane.xlu1 %292 }
 0x192   : > { %1637 = vrsqrt.f32 %v296_v46  ;;  %v295_v48 = vmul.f32 0.0078125, %v293_v47 }
 0x194   : > { %v297_v49 = vadd.f32 1e-05, %v295_v48 }
 0x196   : > { %1639 = vrsqrt.f32 %v297_v49 }
 0x19c   : > { %v1638_v50 = vpop.eup %1637 }
 0x19d   : > { %v300_v51 = vmul.f32 %v1638_v50, %v2053_v11  ;;  %v1615_v11 = vld [vmem:[#allocation5 + $0x130] ss:$24 sps:$4 sm:$0xff]  }
 0x19f   : > { %v308_v55 = vmul.f32 %v1300_v52, %v300_v51  ;;  %v1621_v51 = vld [vmem:[#allocation7] sm:$0xff]  }
 0x1a0   : > { %v1640_v53 = vpop.eup %1639 }
 0x1a1   : > { %v301_v54 = vmul.f32 %v1640_v53, %v2058_v15  ;;  %v316_v58 = vadd.f32 %v1301_v56, %v308_v55  ;;  %v1623_v53 = vld [vmem:[#allocation7 + $0x10] sm:$0xff]   ;;  %v1625_v55 = vld [vmem:[#allocation7 + $0x20] sm:$0xff]  }
 0x1a3   : > { %v309_v57 = vmul.f32 %v1300_v52, %v301_v54  ;;  %v1622_v52 = vld [vmem:[#allocation7 + $0x8] sm:$0xff]   ;;  %v1624_v54 = vld [vmem:[#allocation7 + $0x18] sm:$0xff]  }
 0x1a5   : > { %v317_v59 = vadd.f32 %v1301_v56, %v309_v57  ;;  %v1626_v56 = vld [vmem:[#allocation7 + $0x28] sm:$0xff]   ;;  %v1627_v57 = vld [vmem:[#allocation7 + $0x30] sm:$0xff]  }
 0x1a7   : > { %v318_v61 = vpack.c.bf16 %v317_v59, %v316_v58 }
 0x1a9   : > { %640 = vmatmul.mubr.bf16.vlgmr.msra.gmra.mrb[0].mxu0 %v318_v61  ;;  %683 = vmatmul.mubr.bf16.vlgmr.msra.gmra.mrb[0].mxu1 %v318_v61 }
 0x1aa   : > { %694 = vmatpush1.bf16.msra.mxu0 %v1597_v60  ;;  %725 = vmatprep.mubr.bf16.mxu0 %v1824_v36 }
 0x1ab   : > { %695 = vmatprep.subr.bf16.mxu0 %v1602_v62  ;;  %1429 = vmatprep.mubr.msk.bf16.mxu1 %vm1826_vm0, %v1825_v14 }
 0x1ac   : > { %1414 = vmatpush3.bf16.msra.mxu1 %v1621_v51 }
 0x1ad   : > { %1415 = vmatprep.subr.bf16.mxu1 %v1825_v14 }
 0x1ae   : > { %696 = vmatpush1.bf16.msra.mxu0 %v1600_v63 }
 0x1af   : > { %697 = vmatprep.subr.bf16.mxu0 %v1605_v2 }
 0x1b0   : > { %1416 = vmatpush3.bf16.msra.mxu1 %v1622_v52 }
 0x1b1   : > { %1417 = vmatprep.subr.bf16.mxu1 %v1825_v14 }
 0x1b2   : > { %698 = vmatpush1.bf16.msra.mxu0 %v1603_v3  ;;  %v1628_v3 = vld [vmem:[#allocation7 + $0x38] sm:$0xff]  }
 0x1b3   : > { %699 = vmatprep.subr.bf16.mxu0 %v1608_v4 }
 0x1b4   : > { %1418 = vmatpush3.bf16.msra.mxu1 %v1623_v53 }
 0x1b5   : > { %1419 = vmatprep.subr.bf16.mxu1 %v1825_v14 }
 0x1b6   : > { %700 = vmatpush1.bf16.msra.mxu0 %v1606_v5 }
 0x1b7   : > { %701 = vmatprep.subr.bf16.mxu0 %v1611_v6 }
 0x1b8   : > { %1420 = vmatpush3.bf16.msra.mxu1 %v1624_v54 }
 0x1b9   : > { %1421 = vmatprep.subr.bf16.mxu1 %v1825_v14 }
 0x1ba   : > { %702 = vmatpush1.bf16.msra.mxu0 %v1609_v7 }
 0x1bb   : > { %703 = vmatprep.subr.bf16.mxu0 %v1614_v8 }
 0x1bc   : > { %1422 = vmatpush3.bf16.msra.mxu1 %v1625_v55 }
 0x1bd   : > { %1423 = vmatprep.subr.bf16.mxu1 %v1825_v14 }
 0x1be   : > { %704 = vmatpush1.bf16.msra.mxu0 %v1612_v9 }
 0x1bf   : > { %705 = vmatprep.subr.bf16.mxu0 %v1617_v10 }
 0x1c0   : > { %1424 = vmatpush3.bf16.msra.mxu1 %v1626_v56 }
 0x1c1   : > { %1425 = vmatprep.subr.bf16.mxu1 %v1825_v14 }
 0x1c2   : > { %706 = vmatpush1.bf16.msra.mxu0 %v1615_v11 }
 0x1c3   : > { %707 = vmatprep.subr.bf16.mxu0 %v1620_v12 }
 0x1c4   : > { %1426 = vmatpush3.bf16.msra.mxu1 %v1627_v57 }
 0x1c5   : > { %1427 = vmatprep.subr.bf16.mxu1 %v1825_v14 }
 0x1c6   : > { %708 = vmatpush1.bf16.msra.mxu0 %v1618_v13 }
 0x1c7   : > { %1401 = vmatprep.subr.bf16.mxu0 %v1825_v14 }
 0x1c8   : > { %1428 = vmatpush3.bf16.msra.mxu1 %v1628_v3 }
 0x1c9   : > { %726 = vmatmul.mubr.bf16.vlgmr.msra.gmra.mrb[4].mxu0 %v318_v61  ;;  %1445 = vmatprep.subr.bf16.mxu1 %v1825_v14 }
 0x1ca   : > { %1403 = vmatprep.mubr.msk.bf16.mxu0 %vm1826_vm0, %v1825_v14 }
 0x27c   : > { %v641_v15 = vpop.f32.mrb[0].mxu0  ;;  %v684_v16 = vpop.f32.mrb[0].mxu1 }
 0x27d   : > { %v2076_v17 = vpop.f32.mrb[1].mxu0  ;;  %v2078_v18 = vpop.f32.mrb[1].mxu1 }
 0x27e   : > { %v645_v19 = vpop.f32.mrb[2].mxu0  ;;  %v688_v20 = vpop.f32.mrb[2].mxu1 }
 0x27f   : > { %v736_v21 = vpack.c.bf16 %v645_v19, %v641_v15  ;;  %v738_v22 = vpack.c.bf16 %v688_v20, %v684_v16  ;;  %v2080_v23 = vpop.f32.mrb[3].mxu0  ;;  %v2082_v24 = vpop.f32.mrb[3].mxu1 }
 0x280   : > { %v737_v25 = vpack.c.bf16 %v2080_v23, %v2076_v17  ;;  %v739_v26 = vpack.c.bf16 %v2082_v24, %v2078_v18 }
 0x281   : > { %1402 = vmatpush3.bf16.xpose.msra.mxu0 %v738_v22 }
 0x282   : > { %1407 = vmatprep.subr.bf16.mxu0 %v1825_v14 }
 0x288   : > { %1404 = vmatmul.mubr.bf16.vlgmr.msra.gmra.mrb[8].mxu0 %v736_v21 }
 0x289   : > { %1409 = vmatprep.mubr.msk.bf16.mxu0 %vm1826_vm0, %v1825_v14 }
 0x29c   : > { %v727_v27 = vpop.f32.mrb[4].mxu0 }
 0x29d   : > { %v2091_v28 = vpop.f32.mrb[5].mxu0 }
 0x29e   : > { %v731_v29 = vpop.f32.mrb[6].mxu0 }
 0x29f   : > { %v740_v30 = vpack.c.bf16 %v731_v29, %v727_v27  ;;  %v2093_v31 = vpop.f32.mrb[7].mxu0  ;;  %v1630_v29 = vld [vmem:[#allocation7 + $0x48] sm:$0xff]  }
 0x2a0   : > { %v741_v32 = vpack.c.bf16 %v2093_v31, %v2091_v28  ;;  %v1629_v28 = vld [vmem:[#allocation7 + $0x40] sm:$0xff]   ;;  %v1632_v31 = vld [vmem:[#allocation7 + $0x58] sm:$0xff]  }
 0x2a1   : > { %1408 = vmatpush3.bf16.msra.mxu0 %v740_v30  ;;  %v1631_v30 = vld [vmem:[#allocation7 + $0x50] sm:$0xff]  }
 0x2a2   : > { %1433 = vmatprep.subr.bf16.mxu0 %v1825_v14 }
 0x35b   : > { %v776_v33 = vpop.f32.mrb[8].mxu0 }
 0x35c   : > { %v783_v34 = vmul.f32 0.088388346, %v776_v33  ;;  %v1405_v35 = vpop.f32.mrb[9].mxu0  ;;  %v1634_v33 = vld [vmem:[#allocation7 + $0x68] sm:$0xff]  }
 0x35d   : > { %v779_v36 = vpop.f32.mrb[10].mxu0 }
 0x35e   : > { %v784_v37 = vmul.f32 0.088388346, %v779_v36  ;;  %v1406_v38 = vpop.f32.mrb[11].mxu0  ;;  %v786_v39 = vsel %vm785_vm1, %v783_v34, -inf }
 0x35f   : > { %787 = vmax.xlane.f32.xlu0 %v786_v39 }
 0x360   : > { %v789_v40 = vsel %vm785_vm1, %v784_v37, -inf }
 0x361   : > { %790 = vmax.xlane.f32.xlu1 %v789_v40 }
 0x3ec   : > { %v788_v41 = vpop.xlane.xlu0 %787 }
 0x3ed   : > { %v792_v42 = vsub.f32 %v783_v34, %v788_v41  ;;  %v1635_v34 = vld [vmem:[#allocation7 + $0x70] sm:$0xff]  }
 0x3ee   : > { %v791_v43 = vpop.xlane.xlu1 %790 }
 0x3ef   : > { %v794_v44 = vmul.f32 1.442695, %v792_v42  ;;  %v793_v45 = vsub.f32 %v784_v37, %v791_v43  ;;  %v1636_v42 = vld [vmem:[#allocation7 + $0x78] sm:$0xff]  }
 0x3f1   : > { %1641 = vpow2.f32 %v794_v44  ;;  %v796_v46 = vmul.f32 1.442695, %v793_v45 }
 0x3f3   : > { %1643 = vpow2.f32 %v796_v46 }
 0x3fb   : > { %v1642_v47 = vpop.eup %1641 }
 0x3fc   : > { %v798_v48 = vsel %vm785_vm1, %v1642_v47, 0.0 }
 0x3fd   : > { %v1644_v49 = vpop.eup %1643  ;;  %799 = vadd.xlane.f32.xlu0 %v798_v48 }
 0x3fe   : > { %v801_v50 = vsel %vm785_vm1, %v1644_v49, 0.0 }
 0x3ff   : > { %802 = vadd.xlane.f32.xlu1 %v801_v50 }
 0x48a   : > { %v800_v58 = vpop.xlane.xlu0 %799 }
 0x48b   : > { %1645 = vrcp.f32 %v800_v58 }
 0x48c   : > { %v803_v59 = vpop.xlane.xlu1 %802 }
 0x48d   : > { %1647 = vrcp.f32 %v803_v59 }
 0x495   : > { %v1646_v60 = vpop.eup %1645 }
 0x496   : > { %v806_v62 = vmul.f32 %v1646_v60, %v1642_v47 }
 0x497   : > { %v1648_v61 = vpop.eup %1647 }
 0x498   : > { %v807_v63 = vmul.f32 %v1648_v61, %v1644_v49 }
 0x49a   : > { %v808_v2 = vpack.c.bf16 %v807_v63, %v806_v62 }
 0x49c   : > { %1410 = vmatmul.mubr.msk.bf16.vlgmr.msra.gmra.mrb[12].mxu0 %vm785_vm1, %v808_v2 }
 0x49d   : > { %1434 = vmatpush3.bf16.xpose.msra.mxu0 %v739_v26  ;;  %1435 = vmatprep.mubr.msk.bf16.mxu0 %vm1826_vm0, %v1825_v14 }
 0x49e   : > { %1439 = vmatprep.subr.bf16.mxu0 %v1825_v14 }
 0x4a4   : > { %1436 = vmatmul.mubr.bf16.vlgmr.msra.gmra.mrb[16].mxu0 %v737_v25 }
 0x4a5   : > { %1440 = vmatpush3.bf16.msra.mxu0 %v741_v32  ;;  %1441 = vmatprep.mubr.msk.bf16.mxu0 %vm1826_vm0, %v1825_v14  ;;  %v1633_v32 = vld [vmem:[#allocation7 + $0x60] sm:$0xff]  }
 0x56f   : > { %v846_v4 = vpop.f32.mrb[12].mxu0 }
 0x570   : > { %v1411_v5 = vpop.f32.mrb[13].mxu0 }
 0x571   : > { %v849_v6 = vpop.f32.mrb[14].mxu0 }
 0x572   : > { %v853_v7 = vpack.c.bf16 %v849_v6, %v846_v4  ;;  %v1412_v8 = vpop.f32.mrb[15].mxu0 }
 0x574   : > { %1430 = vmatmul.mubr.bf16.vlgmr.msra.gmra.mrb[4].mxu1 %v853_v7 }
 0x575   : > { %1461 = vmatprep.mubr.msk.bf16.mxu1 %vm1826_vm0, %v1825_v14  ;;  %1446 = vmatpush3.bf16.msra.mxu1 %v1629_v28 }
 0x576   : > { %1447 = vmatprep.subr.bf16.mxu1 %v1825_v14 }
 0x577   : > { %v995_v9 = vpop.f32.mrb[16].mxu0 }
 0x578   : > { %v1002_v10 = vmul.f32 0.088388346, %v995_v9  ;;  %v1437_v11 = vpop.f32.mrb[17].mxu0 }
 0x579   : > { %v998_v12 = vpop.f32.mrb[18].mxu0  ;;  %1448 = vmatpush3.bf16.msra.mxu1 %v1630_v29 }
 0x57a   : > { %v1003_v13 = vmul.f32 0.088388346, %v998_v12  ;;  %v1438_v15 = vpop.f32.mrb[19].mxu0  ;;  %v1004_v16 = vsel %vm785_vm1, %v1002_v10, -inf  ;;  %1449 = vmatprep.subr.bf16.mxu1 %v1825_v14 }
 0x57b   : > { %1005 = vmax.xlane.f32.xlu0 %v1004_v16 }
 0x57c   : > { %v1007_v17 = vsel %vm785_vm1, %v1003_v13, -inf }
 0x57d   : > { %1008 = vmax.xlane.f32.xlu1 %v1007_v17  ;;  %1450 = vmatpush3.bf16.msra.mxu1 %v1631_v30 }
 0x57e   : > { %1451 = vmatprep.subr.bf16.mxu1 %v1825_v14 }
 0x581   : > { %1452 = vmatpush3.bf16.msra.mxu1 %v1632_v31 }
 0x582   : > { %1453 = vmatprep.subr.bf16.mxu1 %v1825_v14 }
 0x585   : > { %1454 = vmatpush3.bf16.msra.mxu1 %v1633_v32 }
 0x586   : > { %1455 = vmatprep.subr.bf16.mxu1 %v1825_v14 }
 0x589   : > { %1456 = vmatpush3.bf16.msra.mxu1 %v1634_v33 }
 0x58a   : > { %1457 = vmatprep.subr.bf16.mxu1 %v1825_v14 }
 0x58d   : > { %1458 = vmatpush3.bf16.msra.mxu1 %v1635_v34 }
 0x58e   : > { %1459 = vmatprep.subr.bf16.mxu1 %v1825_v14 }
 0x591   : > { %1460 = vmatpush3.bf16.msra.mxu1 %v1636_v42 }
 0x608   : > { %v1006_v18 = vpop.xlane.xlu0 %1005 }
 0x609   : > { %v1010_v19 = vsub.f32 %v1002_v10, %v1006_v18 }
 0x60a   : > { %v1009_v20 = vpop.xlane.xlu1 %1008 }
 0x60b   : > { %v1012_v21 = vmul.f32 1.442695, %v1010_v19  ;;  %v1011_v22 = vsub.f32 %v1003_v13, %v1009_v20 }
 0x60d   : > { %1649 = vpow2.f32 %v1012_v21  ;;  %v1014_v23 = vmul.f32 1.442695, %v1011_v22 }
 0x60f   : > { %1651 = vpow2.f32 %v1014_v23 }
 0x617   : > { %v1650_v24 = vpop.eup %1649 }
 0x618   : > { %v1016_v25 = vsel %vm785_vm1, %v1650_v24, 0.0 }
 0x619   : > { %v1652_v26 = vpop.eup %1651  ;;  %1017 = vadd.xlane.f32.xlu0 %v1016_v25 }
 0x61a   : > { %v1019_v27 = vsel %vm785_vm1, %v1652_v26, 0.0 }
 0x61b   : > { %1020 = vadd.xlane.f32.xlu1 %v1019_v27 }
 0x6a6   : > { %v1018_v35 = vpop.xlane.xlu0 %1017 }
 0x6a7   : > { %1653 = vrcp.f32 %v1018_v35 }
 0x6a8   : > { %v1021_v36 = vpop.xlane.xlu1 %1020 }
 0x6a9   : > { %1655 = vrcp.f32 %v1021_v36 }
 0x6b1   : > { %v1654_v37 = vpop.eup %1653 }
 0x6b2   : > { %v1024_v39 = vmul.f32 %v1654_v37, %v1650_v24 }
 0x6b3   : > { %v1656_v38 = vpop.eup %1655 }
 0x6b4   : > { %v1025_v40 = vmul.f32 %v1656_v38, %v1652_v26 }
 0x6b6   : > { %v1026_v41 = vpack.c.bf16 %v1025_v40, %v1024_v39 }
 0x6b8   : > { %1442 = vmatmul.mubr.msk.bf16.vlgmr.msra.gmra.mrb[20].mxu0 %vm785_vm1, %v1026_v41 }
 0x78b   : > { %v1064_v43 = vpop.f32.mrb[20].mxu0 }
 0x78c   : > { %v1443_v44 = vpop.f32.mrb[21].mxu0 }
 0x78d   : > { %v1067_v45 = vpop.f32.mrb[22].mxu0 }
 0x78e   : > { %v1071_v46 = vpack.c.bf16 %v1067_v45, %v1064_v43  ;;  %v1444_v14 = vpop.f32.mrb[23].mxu0 }
 0x790   : > { %1462 = vmatmul.mubr.bf16.vlgmr.msra.gmra.mrb[4].mxu1 %v1071_v46 }
 0x863   : > { %v1170_v47 = vpop.f32.mrb[4].mxu1 }
 0x864   : > { %v1465_v48 = vadd.f32 %v1170_v47, %v2046_v0  ;;  %v1463_v49 = vpop.f32.mrb[5].mxu1 }
 0x865   : > { %v1173_v50 = vpop.f32.mrb[6].mxu1 }
 0x866   : > { %1179 = vst [vmem:[%s271_s12] sm:$0xff] %v1465_v48  ;;  %v1466_v51 = vadd.f32 %v1173_v50, %v2048_v1  ;;  %v1464_v52 = vpop.f32.mrb[7].mxu1 }
 0x868   : > { %1180 = vst [vmem:[%s271_s12 + $0x8] sm:$0xff] %v1466_v51 }
 0x869   : > { %1756 = shalt.err (!%p1753_p2)
}
 0x86a   : > { %s1757_s6 = scalar_lea.hbm %s2145_s11, 256  ;;  %s1761_s10 = scalar_lea.hbm %s2195_s5, 512 }
 0x86b   : > { %p1758_p13 = scmp.ne.s32.totalorder %s2145_s11, %s1757_s6  ;;  %p1762_p4 = scmp.lt.u32.totalorder %s2145_s11, %s2195_s5 }
 0x86c   : > { %p1763_p7 = scmp.lt.u32.totalorder %s1761_s10, %s1757_s6  ;;  %p1765_p11 = scmp.lt.u32.totalorder %s1757_s6, %s2145_s11 }
 0x86d   : > { %p1759_p6 = pnand %p1758_p13, %p2209_p0 }
 0x86e   : > { %p1764_p8 = por %p1763_p7, %p1762_p4 }
 0x86f   : > { %p1760_p10 = pneg %p1759_p6 }
 0x870   : > { %p1766_p1 = por %p1765_p11, %p1764_p8 }
 0x872   : > { %p1767_p3 = pnand %p1766_p1, %p1760_p10 }
 0x874   : > { %1770 = shalt.err (!%p1767_p3)
}
 0x875   : > { %s1828_s29 = smov 128   ;;  %s1829_s8 = smov 8  }
 0x876   : > { %1481 = dma.vmem_to_hbm [thread:$0]  (%p2209_p0), %s2140_s13, 256, %s2145_s11, %s1182_s22, %s1828_s29, %s1828_s29, %s1829_s8  }
 0x877 PF: > { %s1210_s9 = sand.u32 1, %s1801_s18   ;;  %p2210_p5 = scmp.ne.s32.totalorder %s2200_s25, 0 }
 0x878   : > { %p2211_p9 = scmp.ge.s32.totalorder %s1813_s21, 2  ;;  %s1211_s14 = scalar_lea.sflag [#allocation4], %s1210_s9 }
 0x87a   : > { %p1495_p12 = pnand %p2211_p9, %p2210_p5 }
 0x87c   : > { %1796 = dma.done.wait (!%p1495_p12), %s1211_s14, 256  }
 0x87d   : > { %1798 = vsyncadd (!%p1495_p12), %s1211_s14, 4294967040  ;;  %p19_p2 = scmp.ge.s32.totalorder %s1970_s16, 4   ;;  %s2212_s18 = smov %s1805_s19 }
 0x87e   : > { %s2213_s19 = smov %s1809_s20  ;;  %s2214_s20 = smov %s1979_s27 }
 0x87f   : > { %s2215_s21 = smov %s1970_s16  ;;  %21 = sbr.rel (!%p19_p2) target bundleno = 6 (0x6), region = 93 }
 0x886   :  { %1216 = vsyncpa [#allocation3], 1 }
 0x887   :  { %1218 = vsyncpa [#allocation3 + $0x1], 1 }
 0x888   :  { %1219 = vsyncpa [#allocation6], 1 }
 0x889   :  { %1220 = vsyncpa [#allocation4], 1 }
 0x88a   :  { %1222 = vsyncpa [#allocation4 + $0x1], 1 }

</bundles_post_ra>
